<compile_context>
chip_gen: v5e
topology: v5e:2x2
jax: 0.10.0
libtpu: 0.0.40
codegen_flags: <defaults>
</compile_context>

<pallas_src>
import functools

import jax
import jax.numpy as jnp
from jax.experimental import pallas as pl
from jax.experimental.pallas import tpu as pltpu


def _conv_kernel(ma_ref, mb_ref, xc_ref, xp_ref, o_ref, acc_ref):
    """One (time-tile i, delay-band c) grid step of the causal FIR.

    ma_ref : (1, T, T)  taps hitting sources inside tile (i - c)
    mb_ref : (1, T, T)  taps hitting sources inside tile (i - c - 1)
    xc_ref : (B, T)     x tile (i - c)      (block index clamped to >= 0)
    xp_ref : (B, T)     x tile (i - c - 1)  (block index clamped to >= 0)
    o_ref  : (B, T)     output tile i
    acc_ref: (B, T)     float32 accumulator (lives across the band axis)
    """
    i = pl.program_id(0)
    c = pl.program_id(1)
    nb = pl.num_programs(1)

    @pl.when(c == 0)
    def _init():
        acc_ref[...] = jnp.zeros_like(acc_ref)

    # Contribution of x tile (i - c); skipped (== zero history) when i - c < 0.
    @pl.when(i - c >= 0)
    def _same_tile():
        acc_ref[...] += jnp.dot(xc_ref[...], ma_ref[0],
                                preferred_element_type=jnp.float32)

    # Contribution of x tile (i - c - 1); skipped when it lies before t = 0.
    @pl.when(i - c - 1 >= 0)
    def _prev_tile():
        acc_ref[...] += jnp.dot(xp_ref[...], mb_ref[0],
                                preferred_element_type=jnp.float32)

    @pl.when(c == nb - 1)
    def _finalize():
        o_ref[...] = acc_ref[...].astype(o_ref.dtype)


def _build_impulse(noise, decay, wet, *, length, sampling_rate):
    """Reverb.build_impulse() with numerically stable softplus / sigmoid."""
    t = jnp.arange(length, dtype=jnp.float32) / float(sampling_rate)
    env = jnp.exp(-jax.nn.softplus(-decay.astype(jnp.float32)) * t * 500.0)
    imp = noise.astype(jnp.float32).reshape(-1)[:length] * env
    imp = imp * jax.nn.sigmoid(wet.astype(jnp.float32))
    return imp.at[0].set(1.0)                       # impulse[:, 0] = 1


def _build_band_matrices(h, tile_t, num_bands):
    """Banded-Toeplitz tap matrices for the MXU formulation.

    MA[c, k, j] = h[c*T + j - k]       if j >= k and the delay < L, else 0
    MB[c, k, j] = h[(c+1)*T + j - k]   if j <  k and the delay < L, else 0
    so that  y_tile[i] = sum_c x_tile[i-c] @ MA[c] + x_tile[i-c-1] @ MB[c].
    """
    L = h.shape[0]
    T = tile_t
    rel = jnp.arange(T)[None, :] - jnp.arange(T)[:, None]        # j - k
    c = jnp.arange(num_bands)[:, None, None]                     # (NB, 1, 1)
    d_same = c * T + rel
    d_prev = (c + 1) * T + rel
    taps_same = jnp.take(h, jnp.clip(d_same, 0, L - 1))
    taps_prev = jnp.take(h, jnp.clip(d_prev, 0, L - 1))
    ma = jnp.where((rel >= 0) & (d_same < L), taps_same, 0.0)
    mb = jnp.where((rel < 0) & (d_prev < L), taps_prev, 0.0)
    return ma, mb                                                # (NB, T, T) each


def reverb_forward(x, noise, decay, wet, *, length, sampling_rate,
                   tile_t=512, compute_dtype=jnp.float32):
    """Pallas equivalent of Reverb.forward.  x: (B, N, 1) float -> (B, N, 1)."""
    B, N, _ = x.shape
    L = int(length)
    T = int(tile_t)
    assert N >= L, "signal must be at least as long as the reverb impulse"
    assert T % 128 == 0, "time tile must be lane-aligned (multiple of 128)"

    num_tiles = pl.cdiv(N, T)
    n_pad = num_tiles * T
    num_bands = pl.cdiv(L, T)

    # ---- parameter-side preprocessing (tiny, plain JAX, once per forward) --
    h = _build_impulse(noise, decay, wet, length=L, sampling_rate=sampling_rate)
    ma, mb = _build_band_matrices(h, T, num_bands)

    x2 = x[..., 0].astype(jnp.float32)                           # (B, N)
    if n_pad != N:
        # Right-pad only when N is not a tile multiple; no left-pad copy,
        # the t<0 boundary is handled inside the kernel with pl.when.
        x2 = jnp.pad(x2, ((0, 0), (0, n_pad - N)))

    # bf16 inputs + f32 accumulation roughly double MXU throughput on v6e/v7x.
    x_in = x2.astype(compute_dtype)
    ma = ma.astype(compute_dtype)
    mb = mb.astype(compute_dtype)

    # VMEM: MA/MB blocks double-buffered = 2 arrays * 2 bufs * T*T*itemsize
    # (T=512 f32 -> 4 MiB), plus O(B*T) for x / out / acc -> far below the
    # 32 MiB scoped default, so the same tiling is safe on v7x's 64 MiB VMEM.
    grid_spec = pltpu.PrefetchScalarGridSpec(
        num_scalar_prefetch=0,
        grid=(num_tiles, num_bands),                 # reduction (band) axis last
        in_specs=[
            pl.BlockSpec((1, T, T), lambda i, c: (c, 0, 0)),          # MA band c
            pl.BlockSpec((1, T, T), lambda i, c: (c, 0, 0)),          # MB band c
            pl.BlockSpec((B, T), lambda i, c: (0, jnp.maximum(i - c, 0))),
            pl.BlockSpec((B, T), lambda i, c: (0, jnp.maximum(i - c - 1, 0))),
        ],
        out_specs=pl.BlockSpec((B, T), lambda i, c: (0, i)),
        scratch_shapes=[pltpu.VMEM((B, T), jnp.float32)],
    )

    y = pl.pallas_call(
        _conv_kernel,
        out_shape=jax.ShapeDtypeStruct((B, n_pad), jnp.float32),
        grid_spec=grid_spec,
        compiler_params=pltpu.CompilerParams(
            dimension_semantics=("parallel", "arbitrary"),
            vmem_limit_bytes=32 * 1024 * 1024,
        ),
    )(ma, mb, x_in, x_in)

    return y[:, :N, None].astype(x.dtype)


def _reference_forward(x, noise, decay, wet, *, length, sampling_rate):
    """Pure-JAX transliteration of the PyTorch module (FFT-based fft_convolve)."""
    B, N, _ = x.shape
    t = jnp.arange(length, dtype=jnp.float32) / sampling_rate
    env = jnp.exp(-jax.nn.softplus(-decay) * t * 500.0)
    imp = noise[:, 0] * env * jax.nn.sigmoid(wet)
    imp = imp.at[0].set(1.0)
    imp = jnp.pad(imp, (0, N - length))[None, :]                # (1, N)
    sig_p = jnp.pad(x[..., 0], ((0, 0), (0, N)))                # right-pad signal
    ker_p = jnp.pad(imp, ((0, 0), (N, 0)))                      # left-pad kernel
    out = jnp.fft.irfft(jnp.fft.rfft(sig_p) * jnp.fft.rfft(ker_p), n=2 * N)
    out = out[..., N:]
    return out[..., None]


if __name__ == "__main__":
    LENGTH = 64            # reverb impulse length (DDSP uses ~sr; kept small here)
    SAMPLING_RATE = 16000
    B, N = 2, 1024         # batch, signal length (lenx)

    key = jax.random.PRNGKey(0)
    k_noise, k_x = jax.random.split(key)

    # Deterministic parameter init mirroring Reverb.__init__.
    noise = jax.random.uniform(k_noise, (LENGTH, 1), jnp.float32, -1.0, 1.0)
    decay = jnp.asarray(5.0, jnp.float32)   # initial_decay
    wet = jnp.asarray(0.0, jnp.float32)     # initial_wet

    x = jax.random.uniform(k_x, (B, N, 1), jnp.float32, -1.0, 1.0)

    fwd_f32 = jax.jit(functools.partial(
        reverb_forward, length=LENGTH, sampling_rate=SAMPLING_RATE, tile_t=256))
    y = jax.block_until_ready(fwd_f32(x, noise, decay, wet))

    y_ref = _reference_forward(x, noise, decay, wet,
                               length=LENGTH, sampling_rate=SAMPLING_RATE)
    assert y.shape == (B, N, 1)
    assert jnp.allclose(y, y_ref, atol=2e-3, rtol=2e-3), "f32 mismatch vs FFT reference"

    # bf16-input / f32-accumulate MXU path (recommended on v6e/v7x).
    fwd_bf16 = jax.jit(functools.partial(
        reverb_forward, length=LENGTH, sampling_rate=SAMPLING_RATE, tile_t=256,
        compute_dtype=jnp.bfloat16))
    y_bf16 = jax.block_until_ready(fwd_bf16(x, noise, decay, wet))
    assert jnp.allclose(y_bf16, y_ref, atol=1e-1, rtol=1e-1), "bf16 mismatch vs FFT reference"

    print("KERNEL_OK")
</pallas_src>

<mosaic_0001>
module attributes {stable_mosaic.version = 11 : i64} {
  func.func @_conv_kernel(%arg0: i32, %arg1: i32, %arg2: memref<1x256x256xf32, #tpu.memory_space<vmem>>, %arg3: memref<1x256x256xf32, #tpu.memory_space<vmem>>, %arg4: memref<2x256xf32, #tpu.memory_space<vmem>>, %arg5: memref<2x256xf32, #tpu.memory_space<vmem>>, %arg6: memref<2x256xf32, #tpu.memory_space<vmem>>, %arg7: memref<2x256xf32, #tpu.memory_space<vmem>>) attributes {dimension_semantics = [#tpu.dimension_semantics<parallel>, #tpu.dimension_semantics<arbitrary>], iteration_bounds = array<i64: 4, 1>, scalar_prefetch = 0 : i64, scratch_operands = 1 : i64, tpu.core_type = #tpu.core_type<tc>, window_params = [{transform_indices = @transform_0, window_bounds = array<i64: 1, 256, 256>}, {transform_indices = @transform_1, window_bounds = array<i64: 1, 256, 256>}, {transform_indices = @transform_2, window_bounds = array<i64: 2, 256>}, {transform_indices = @transform_3, window_bounds = array<i64: 2, 256>}, {transform_indices = @transform_4, window_bounds = array<i64: 2, 256>}]} {
    %c0_i32 = arith.constant 0 : i32
    %0 = arith.cmpi eq, %arg1, %c0_i32 : i32
    %1 = arith.extui %0 : i1 to i32
    %c0_i32_0 = arith.constant 0 : i32
    %2 = arith.cmpi ne, %1, %c0_i32_0 : i32
    scf.if %2 {
      %cst = arith.constant 0.000000e+00 : f32
      %15 = vector.broadcast %cst : f32 to vector<2x256xf32>
      %c0 = arith.constant 0 : index
      %c0_7 = arith.constant 0 : index
      %16 = vector.load %arg7[%c0, %c0_7] : memref<2x256xf32, #tpu.memory_space<vmem>>, vector<2x256xf32>
      tpu.vector_store %arg7[%c0, %c0_7], %15 {strides = array<i32>} : memref<2x256xf32, #tpu.memory_space<vmem>>, vector<2x256xf32>,
    } else {
    }
    %3 = arith.subi %arg0, %arg1 : i32
    %c0_i32_1 = arith.constant 0 : i32
    %4 = arith.cmpi sge, %3, %c0_i32_1 : i32
    %5 = arith.extui %4 : i1 to i32
    %c0_i32_2 = arith.constant 0 : i32
    %6 = arith.cmpi ne, %5, %c0_i32_2 : i32
    scf.if %6 {
      %c0 = arith.constant 0 : index
      %c0_7 = arith.constant 0 : index
      %15 = vector.load %arg7[%c0, %c0_7] : memref<2x256xf32, #tpu.memory_space<vmem>>, vector<2x256xf32>
      %c0_8 = arith.constant 0 : index
      %c0_9 = arith.constant 0 : index
      %16 = vector.load %arg4[%c0_8, %c0_9] : memref<2x256xf32, #tpu.memory_space<vmem>>, vector<2x256xf32>
      %c0_10 = arith.constant 0 : index
      %c0_11 = arith.constant 0 : index
      %c0_12 = arith.constant 0 : index
      %17 = vector.load %arg2[%c0_10, %c0_11, %c0_12] : memref<1x256x256xf32, #tpu.memory_space<vmem>>, vector<1x256x256xf32>
      %18 = vector.shape_cast %17 : vector<1x256x256xf32> to vector<256x256xf32>
      %cst = arith.constant dense<0.000000e+00> : vector<2x256xf32>
      %19 = tpu.matmul %16, %18, %cst {dimension_numbers = #tpu.dot_dimension_numbers<[1], [0], [0], [1], [0, 0, 1, 1], [], []>} : vector<2x256xf32>, vector<256x256xf32>, vector<2x256xf32> -> vector<2x256xf32>
      %20 = arith.addf %15, %19 : vector<2x256xf32>
      %c0_13 = arith.constant 0 : index
      %c0_14 = arith.constant 0 : index
      %21 = vector.load %arg7[%c0_13, %c0_14] : memref<2x256xf32, #tpu.memory_space<vmem>>, vector<2x256xf32>
      tpu.vector_store %arg7[%c0_13, %c0_14], %20 {strides = array<i32>} : memref<2x256xf32, #tpu.memory_space<vmem>>, vector<2x256xf32>,
    } else {
    }
    %7 = arith.subi %arg0, %arg1 : i32
    %c1_i32 = arith.constant 1 : i32
    %8 = arith.subi %7, %c1_i32 : i32
    %c0_i32_3 = arith.constant 0 : i32
    %9 = arith.cmpi sge, %8, %c0_i32_3 : i32
    %10 = arith.extui %9 : i1 to i32
    %c0_i32_4 = arith.constant 0 : i32
    %11 = arith.cmpi ne, %10, %c0_i32_4 : i32
    scf.if %11 {
      %c0 = arith.constant 0 : index
      %c0_7 = arith.constant 0 : index
      %15 = vector.load %arg7[%c0, %c0_7] : memref<2x256xf32, #tpu.memory_space<vmem>>, vector<2x256xf32>
      %c0_8 = arith.constant 0 : index
      %c0_9 = arith.constant 0 : index
      %16 = vector.load %arg5[%c0_8, %c0_9] : memref<2x256xf32, #tpu.memory_space<vmem>>, vector<2x256xf32>
      %c0_10 = arith.constant 0 : index
      %c0_11 = arith.constant 0 : index
      %c0_12 = arith.constant 0 : index
      %17 = vector.load %arg3[%c0_10, %c0_11, %c0_12] : memref<1x256x256xf32, #tpu.memory_space<vmem>>, vector<1x256x256xf32>
      %18 = vector.shape_cast %17 : vector<1x256x256xf32> to vector<256x256xf32>
      %cst = arith.constant dense<0.000000e+00> : vector<2x256xf32>
      %19 = tpu.matmul %16, %18, %cst {dimension_numbers = #tpu.dot_dimension_numbers<[1], [0], [0], [1], [0, 0, 1, 1], [], []>} : vector<2x256xf32>, vector<256x256xf32>, vector<2x256xf32> -> vector<2x256xf32>
      %20 = arith.addf %15, %19 : vector<2x256xf32>
      %c0_13 = arith.constant 0 : index
      %c0_14 = arith.constant 0 : index
      %21 = vector.load %arg7[%c0_13, %c0_14] : memref<2x256xf32, #tpu.memory_space<vmem>>, vector<2x256xf32>
      tpu.vector_store %arg7[%c0_13, %c0_14], %20 {strides = array<i32>} : memref<2x256xf32, #tpu.memory_space<vmem>>, vector<2x256xf32>,
    } else {
    }
    %c0_i32_5 = arith.constant 0 : i32
    %12 = arith.cmpi eq, %arg1, %c0_i32_5 : i32
    %13 = arith.extui %12 : i1 to i32
    %c0_i32_6 = arith.constant 0 : i32
    %14 = arith.cmpi ne, %13, %c0_i32_6 : i32
    scf.if %14 {
      %c0 = arith.constant 0 : index
      %c0_7 = arith.constant 0 : index
      %15 = vector.load %arg7[%c0, %c0_7] : memref<2x256xf32, #tpu.memory_space<vmem>>, vector<2x256xf32>
      %c0_8 = arith.constant 0 : index
      %c0_9 = arith.constant 0 : index
      %16 = vector.load %arg6[%c0_8, %c0_9] : memref<2x256xf32, #tpu.memory_space<vmem>>, vector<2x256xf32>
      tpu.vector_store %arg6[%c0_8, %c0_9], %15 {strides = array<i32>} : memref<2x256xf32, #tpu.memory_space<vmem>>, vector<2x256xf32>,
    } else {
    }
    return
  }
  func.func @transform_0(%arg0: i32, %arg1: i32) -> (i32, i32, i32) {
    %c0_i32 = arith.constant 0 : i32
    %c0_i32_0 = arith.constant 0 : i32
    %c0_i32_1 = arith.constant 0 : i32
    return %arg1, %c0_i32, %c0_i32_0 : i32, i32, i32
  }
  func.func @transform_1(%arg0: i32, %arg1: i32) -> (i32, i32, i32) {
    %c0_i32 = arith.constant 0 : i32
    %c0_i32_0 = arith.constant 0 : i32
    %c0_i32_1 = arith.constant 0 : i32
    return %arg1, %c0_i32, %c0_i32_0 : i32, i32, i32
  }
  func.func @transform_2(%arg0: i32, %arg1: i32) -> (i32, i32) {
    %0 = arith.subi %arg0, %arg1 : i32
    %c0_i32 = arith.constant 0 : i32
    %1 = arith.maxsi %0, %c0_i32 : i32
    %c0_i32_0 = arith.constant 0 : i32
    %c0_i32_1 = arith.constant 0 : i32
    return %c0_i32_0, %1 : i32, i32
  }
  func.func @transform_3(%arg0: i32, %arg1: i32) -> (i32, i32) {
    %0 = arith.subi %arg0, %arg1 : i32
    %c1_i32 = arith.constant 1 : i32
    %1 = arith.subi %0, %c1_i32 : i32
    %c0_i32 = arith.constant 0 : i32
    %2 = arith.maxsi %1, %c0_i32 : i32
    %c0_i32_0 = arith.constant 0 : i32
    %c0_i32_1 = arith.constant 0 : i32
    return %c0_i32_0, %2 : i32, i32
  }
  func.func @transform_4(%arg0: i32, %arg1: i32) -> (i32, i32) {
    %c0_i32 = arith.constant 0 : i32
    %c0_i32_0 = arith.constant 0 : i32
    return %c0_i32, %arg0 : i32, i32
  }
}

</mosaic_0001>

<bundles_post_ra>
// kernel: reverb_forward.1
= control target key start
LH: loop header
LB: loop body
LE: loop exit
PB: predicated region body
PF: predicated region fallthrough
CT: control target
= control target key end

     0   :  { %s867_s15 = smov 0   ;;  %s869_s16 = smov 0   ;;  %s1308_s0 = inlined_call_operand.vmem [shape: f32[1,256,256], index: 0, kind: input, shape index: {}]   ;;  %s1309_s1 = inlined_call_operand.vmem [shape: f32[1,256,256], index: 1, kind: input, shape index: {}]   ;;  %s1310_s2 = inlined_call_operand.vmem [shape: f32[2,1024], index: 2, kind: input, shape index: {}, may-alias: {2,3}]   ;;  %s1311_s3 = inlined_call_operand.vmem [shape: f32[2,1024], index: 3, kind: input, shape index: {}, may-alias: {2,3}]   ;;  %s1312_s4 = inlined_call_operand.vmem [shape: f32[2,1024], index: 4, kind: output, shape index: {}]  }
   0x1   :  { %s871_s17 = smov 0  }
   0x2 LB: > { %s26_s18 = sadd.s32 1, %s835_s16  ;;  %p779_p0 = scmp.ge.s32.totalorder %s839_s17, 1  ;;  %s839_s17 = sphi %s871_s17, %s14_s17   ;;  %s835_s16 = sphi %s869_s16, %s1314_s16   ;;  %s831_s15 = sphi %s867_s15, %s1313_s15  }
   0x3   : > { %p28_p1 = scmp.ge.s32.totalorder %s26_s18, 4  ;;  %p234_p2 = scmp.lt.s32.totalorder %s839_s17, 5 }
   0x5   : > { %s1316_s18 = smov (%p28_p1, %s26_s18), 0  ;;  %p235_p3 = pnand %p779_p0, %p234_p2 }
   0x6   : > { %p293_p4 = scmp.gt.s32.totalorder (!%p235_p3), %s831_s15, 0  ;;  %s889_s19 = sadd.s32 (!%p235_p3), 4294967295, %s831_s15 }
   0x7   : > { %238 = sbr.rel (%p235_p3) target bundleno = 386 (0x182), region = 36  ;;  %p306_p5 = scmp.gt.s32.totalorder (!%p235_p3), %s889_s19, 0 }
   0x8   : > { %s785_s20 = sshll.u32 (!%p235_p3), %s831_s15, 1  ;;  %p787_p9 = scmp.lt.s32.totalorder (!%p235_p3), %s831_s15, 0 }
   0x9   : > { %p319_p8 = scmp.lt.s32.totalorder (!%p235_p3), %s785_s20, 7 }
   0xc   : > { %v841_v0 = vmov 0.0   ;;  %s294_s21 = scalar_select %p293_p4, %s831_s15, 0 }
   0xd   : > { %328 = vst [vmem:[#allocation2] sm:$0xf] %v841_v0  ;;  %s307_s22 = scalar_select %p306_p5, %s889_s19, 0 }
   0xe   : > { %s780_s23 = sshll.u32 %s294_s21, 1  ;;  %s1322_s20 = smov (!%p319_p8, %s785_s20), 7 }
   0xf   : > { %p296_p6 = scmp.lt.s32.totalorder %s780_s23, 7  ;;  %s783_s24 = sshll.u32 %s307_s22, 1 }
  0x10   : > { %p309_p7 = scmp.lt.s32.totalorder %s783_s24, 7  ;;  %s786_s7 = sshll.u32 %s1322_s20, 1 }
  0x11   : > { %s1318_s23 = smov (!%p296_p6, %s780_s23), 7  ;;  %s908_s10 = scalar_lea.vmem %s1312_s4, %s786_s7 }
  0x12   : > { %s1320_s24 = smov (!%p309_p7, %s783_s24), 7  ;;  %s781_s25 = sshll.u32 %s1318_s23, 1 }
  0x13   : > { %s898_s28 = scalar_lea.vmem %s1310_s2, %s781_s25  ;;  %s784_s29 = sshll.u32 %s1320_s24, 1 }
  0x14   : > { %s903_s6 = scalar_lea.vmem %s1311_s3, %s784_s29  ;;  %333 = sbr.rel (%p787_p9) target bundleno = 198 (0xc6), region = 44 }
  0x19   : > { %v367_v1 = vld [vmem:[%s1308_s0 + $0xf8] sm:$0xff]  ;;  %v365_v3 = vld [vmem:[%s1308_s0 + $0xe8] sm:$0xff]  ;;  %v366_v7 = vld [vmem:[%s1308_s0 + $0xf0] sm:$0xff]  ;;  %vm489_vm0 = vcmask 1041408  }
  0x1a   : > { %v399_v2 = vld [vmem:[%s1308_s0 + $0x1f8] sm:$0xff]  ;;  %446 = vmatpush.msra.mxu2 %v367_v1  ;;  %v397_v4 = vld [vmem:[%s1308_s0 + $0x1e8] sm:$0xff]  ;;  %v398_v9 = vld [vmem:[%s1308_s0 + $0x1f0] sm:$0xff]  ;;  %406 = vmatpush.msra.mxu0 %v366_v7 }
  0x1b   : > { %466 = vmatpush.msra.mxu3 %v399_v2  ;;  %v363_v5 = vld [vmem:[%s1308_s0 + $0xd8] sm:$0xff]  ;;  %v361_v8 = vld [vmem:[%s1308_s0 + $0xc8] sm:$0xff]  ;;  %426 = vmatpush.msra.mxu1 %v398_v9  ;;  %v364_v11 = vld [vmem:[%s1308_s0 + $0xe0] sm:$0xff] }
  0x1c   : > { %v395_v6 = vld [vmem:[%s1308_s0 + $0x1d8] sm:$0xff]  ;;  %447 = vmatpush.msra.mxu2 %v365_v3  ;;  %v393_v10 = vld [vmem:[%s1308_s0 + $0x1c8] sm:$0xff]  ;;  %v396_v12 = vld [vmem:[%s1308_s0 + $0x1e0] sm:$0xff]  ;;  %407 = vmatpush.msra.mxu0 %v364_v11 }
  0x1d   : > { %467 = vmatpush.msra.mxu3 %v397_v4  ;;  %v362_v13 = vld [vmem:[%s1308_s0 + $0xd0] sm:$0xff]  ;;  %v359_v15 = vld [vmem:[%s1308_s0 + $0xb8] sm:$0xff]  ;;  %427 = vmatpush.msra.mxu1 %v396_v12  ;;  %v360_v17 = vld [vmem:[%s1308_s0 + $0xc0] sm:$0xff] }
  0x1e   : > { %448 = vmatpush.msra.mxu2 %v363_v5  ;;  %v394_v14 = vld [vmem:[%s1308_s0 + $0x1d0] sm:$0xff]  ;;  %v391_v16 = vld [vmem:[%s1308_s0 + $0x1b8] sm:$0xff]  ;;  %v392_v18 = vld [vmem:[%s1308_s0 + $0x1c0] sm:$0xff]  ;;  %408 = vmatpush.msra.mxu0 %v362_v13 }
  0x1f   : > { %468 = vmatpush.msra.mxu3 %v395_v6  ;;  %v357_v19 = vld [vmem:[%s1308_s0 + $0xa8] sm:$0xff]  ;;  %428 = vmatpush.msra.mxu1 %v394_v14  ;;  %v358_v21 = vld [vmem:[%s1308_s0 + $0xb0] sm:$0xff]  ;;  %v355_v23 = vld [vmem:[%s1308_s0 + $0x98] sm:$0xff] }
  0x20   : > { %449 = vmatpush.msra.mxu2 %v361_v8  ;;  %v389_v20 = vld [vmem:[%s1308_s0 + $0x1a8] sm:$0xff]  ;;  %v390_v22 = vld [vmem:[%s1308_s0 + $0x1b0] sm:$0xff]  ;;  %v387_v24 = vld [vmem:[%s1308_s0 + $0x198] sm:$0xff]  ;;  %409 = vmatpush.msra.mxu0 %v360_v17 }
  0x21   : > { %469 = vmatpush.msra.mxu3 %v393_v10  ;;  %429 = vmatpush.msra.mxu1 %v392_v18  ;;  %v356_v25 = vld [vmem:[%s1308_s0 + $0xa0] sm:$0xff]  ;;  %v353_v27 = vld [vmem:[%s1308_s0 + $0x88] sm:$0xff]  ;;  %v354_v29 = vld [vmem:[%s1308_s0 + $0x90] sm:$0xff] }
  0x22   : > { %450 = vmatpush.msra.mxu2 %v359_v15  ;;  %v388_v26 = vld [vmem:[%s1308_s0 + $0x1a0] sm:$0xff]  ;;  %v385_v28 = vld [vmem:[%s1308_s0 + $0x188] sm:$0xff]  ;;  %410 = vmatpush.msra.mxu0 %v358_v21  ;;  %v386_v30 = vld [vmem:[%s1308_s0 + $0x190] sm:$0xff] }
  0x23   : > { %470 = vmatpush.msra.mxu3 %v391_v16  ;;  %430 = vmatpush.msra.mxu1 %v390_v22  ;;  %v351_v31 = vld [vmem:[%s1308_s0 + $0x78] sm:$0xff]  ;;  %v352_v33 = vld [vmem:[%s1308_s0 + $0x80] sm:$0xff]  ;;  %v349_v35 = vld [vmem:[%s1308_s0 + $0x68] sm:$0xff] }
  0x24   : > { %451 = vmatpush.msra.mxu2 %v357_v19  ;;  %v383_v32 = vld [vmem:[%s1308_s0 + $0x178] sm:$0xff]  ;;  %411 = vmatpush.msra.mxu0 %v356_v25  ;;  %v384_v34 = vld [vmem:[%s1308_s0 + $0x180] sm:$0xff]  ;;  %v381_v36 = vld [vmem:[%s1308_s0 + $0x168] sm:$0xff] }
  0x25   : > { %471 = vmatpush.msra.mxu3 %v389_v20  ;;  %431 = vmatpush.msra.mxu1 %v388_v26  ;;  %v350_v37 = vld [vmem:[%s1308_s0 + $0x70] sm:$0xff]  ;;  %v347_v39 = vld [vmem:[%s1308_s0 + $0x58] sm:$0xff]  ;;  %v335_v41 = vld [vmem:[%s898_s28] sm:$0xf] }
  0x26   : > { %452 = vmatpush.msra.mxu2 %v355_v23  ;;  %412 = vmatpush.msra.mxu0 %v354_v29  ;;  %v382_v38 = vld [vmem:[%s1308_s0 + $0x170] sm:$0xff]  ;;  %v379_v40 = vld [vmem:[%s1308_s0 + $0x158] sm:$0xff]  ;;  %v348_v42 = vld [vmem:[%s1308_s0 + $0x60] sm:$0xff]  ;;  %401 = vst [vmem:[#allocation1] ss:$4 sm:$0xff] %v335_v41 }
  0x27   : > { %472 = vmatpush.msra.mxu3 %v387_v24  ;;  %432 = vmatpush.msra.mxu1 %v386_v30  ;;  %v380_v43 = vld [vmem:[%s1308_s0 + $0x160] sm:$0xff]  ;;  %v345_v44 = vld [vmem:[%s1308_s0 + $0x48] sm:$0xff]  ;;  %v346_v46 = vld [vmem:[%s1308_s0 + $0x50] sm:$0xff] }
  0x28   : > { %453 = vmatpush.msra.mxu2 %v353_v27  ;;  %413 = vmatpush.msra.mxu0 %v352_v33  ;;  %v377_v45 = vld [vmem:[%s1308_s0 + $0x148] sm:$0xff]  ;;  %v378_v47 = vld [vmem:[%s1308_s0 + $0x150] sm:$0xff]  ;;  %v343_v48 = vld [vmem:[%s1308_s0 + $0x38] sm:$0xff] }
  0x29   : > { %473 = vmatpush.msra.mxu3 %v385_v28  ;;  %433 = vmatpush.msra.mxu1 %v384_v34  ;;  %v375_v49 = vld [vmem:[%s1308_s0 + $0x138] sm:$0xff]  ;;  %v344_v50 = vld [vmem:[%s1308_s0 + $0x40] sm:$0xff]  ;;  %v341_v52 = vld [vmem:[%s1308_s0 + $0x28] sm:$0xff] }
  0x2a   : > { %454 = vmatpush.msra.mxu2 %v351_v31  ;;  %414 = vmatpush.msra.mxu0 %v350_v37  ;;  %v376_v51 = vld [vmem:[%s1308_s0 + $0x140] sm:$0xff]  ;;  %v373_v53 = vld [vmem:[%s1308_s0 + $0x128] sm:$0xff]  ;;  %v342_v54 = vld [vmem:[%s1308_s0 + $0x30] sm:$0xff] }
  0x2b   : > { %474 = vmatpush.msra.mxu3 %v383_v32  ;;  %434 = vmatpush.msra.mxu1 %v382_v38  ;;  %v374_v55 = vld [vmem:[%s1308_s0 + $0x130] sm:$0xff]  ;;  %v339_v56 = vld [vmem:[%s1308_s0 + $0x18] sm:$0xff]  ;;  %v340_v58 = vld [vmem:[%s1308_s0 + $0x20] sm:$0xff] }
  0x2c   : > { %455 = vmatpush.msra.mxu2 %v349_v35  ;;  %415 = vmatpush.msra.mxu0 %v348_v42  ;;  %v371_v57 = vld [vmem:[%s1308_s0 + $0x118] sm:$0xff]  ;;  %v372_v59 = vld [vmem:[%s1308_s0 + $0x120] sm:$0xff]  ;;  %v337_v60 = vld [vmem:[%s1308_s0 + $0x8] sm:$0xff] }
  0x2d   : > { %475 = vmatpush.msra.mxu3 %v381_v36  ;;  %435 = vmatpush.msra.mxu1 %v380_v43  ;;  %v369_v61 = vld [vmem:[%s1308_s0 + $0x108] sm:$0xff]  ;;  %v402_v62 = vld.sshfl [vmem:[#allocation1] sm:$0xff pattern:$0x73625140]  ;;  %v338_v0 = vld [vmem:[%s1308_s0 + $0x10] sm:$0xff] }
  0x2e   : > { %456 = vmatpush.msra.mxu2 %v347_v39  ;;  %416 = vmatpush.msra.mxu0 %v346_v46  ;;  %v403_v63 = vld.sshfl [vmem:[#allocation1 + $0x8] sm:$0xff pattern:$0x73625140]  ;;  %v370_v1 = vld [vmem:[%s1308_s0 + $0x110] sm:$0xff]  ;;  %v336_v2 = vld [vmem:[%s1308_s0] sm:$0xff] }
  0x2f   : > { %476 = vmatpush.msra.mxu3 %v379_v40  ;;  %436 = vmatpush.msra.mxu1 %v378_v47  ;;  %v368_v3 = vld [vmem:[%s1308_s0 + $0x100] sm:$0xff]  ;;  %v334_v11 = vld [vmem:[#allocation2] sm:$0xf] }
  0x30   : > { %457 = vmatpush.msra.mxu2 %v345_v44  ;;  %417 = vmatpush.msra.mxu0 %v344_v50 }
  0x31   : > { %477 = vmatpush.msra.mxu3 %v377_v45  ;;  %437 = vmatpush.msra.mxu1 %v376_v51 }
  0x32   : > { %458 = vmatpush.msra.mxu2 %v343_v48  ;;  %418 = vmatpush.msra.mxu0 %v342_v54 }
  0x33   : > { %478 = vmatpush.msra.mxu3 %v375_v49  ;;  %438 = vmatpush.msra.mxu1 %v374_v55 }
  0x34   : > { %459 = vmatpush.msra.mxu2 %v341_v52  ;;  %419 = vmatpush.msra.mxu0 %v340_v58 }
  0x35   : > { %479 = vmatpush.msra.mxu3 %v373_v53  ;;  %439 = vmatpush.msra.mxu1 %v372_v59 }
  0x36   : > { %460 = vmatpush.msra.mxu2 %v339_v56  ;;  %420 = vmatpush.msra.mxu0 %v338_v0 }
  0x37   : > { %480 = vmatpush.msra.mxu3 %v371_v57  ;;  %440 = vmatpush.msra.mxu1 %v370_v1 }
  0x38   : > { %461 = vmatpush.msra.mxu2 %v337_v60  ;;  %421 = vmatpush.msra.mxu0 %v336_v2 }
  0x39   : > { %481 = vmatpush.msra.mxu3 %v369_v61  ;;  %462 = vmatmul.f32.vlgmr.msra.gmra.mxu2 %v402_v62 }
  0x3a   : > { %482 = vmatmul.f32.vlgmr.msra.gmra.mxu3 %v403_v63  ;;  %441 = vmatpush.msra.mxu1 %v368_v3 }
  0x3b   : > { %422 = vmatmul.f32.vlgmr.msra.gmra.mxu0 %v402_v62  ;;  %442 = vmatmul.f32.vlgmr.msra.gmra.mxu1 %v403_v63 }
  0xb8   : > { %v423_v4 = vpop.f32.mrf.mxu0  ;;  %v443_v5 = vpop.f32.mrf.mxu1 }
  0xb9   : > { %v444_v9 = vadd.f32 %v443_v5, %v423_v4 }
  0xbc   : > { %v463_v6 = vpop.f32.mrf.mxu2 }
  0xbd   : > { %v483_v7 = vpop.f32.mrf.mxu3 }
  0xbe   : > { %v484_v8 = vadd.f32 %v483_v7, %v463_v6 }
  0xc0   : > { %v488_v10 = vrot.slane %v484_v8, 6 }
  0xc2   : > { %v490_v12 = vsel %vm489_vm0, %v444_v9, %v488_v10 }
  0xc3   : > { %v492_v13 = vadd.f32 %v490_v12, %v334_v11 }
  0xc5   : > { %493 = vst [vmem:[#allocation2] sm:$0xf] %v492_v13 }
  0xc6 PF: > { %p789_p10 = scmp.lt.s32.totalorder %s889_s19, 0 }
  0xc8   : > { %498 = sbr.rel (%p789_p10) target bundleno = 378 (0x17a), region = 48 }
  0xcd   : > { %v532_v14 = vld [vmem:[%s1309_s1 + $0xf8] sm:$0xff]  ;;  %v530_v16 = vld [vmem:[%s1309_s1 + $0xe8] sm:$0xff]  ;;  %v531_v20 = vld [vmem:[%s1309_s1 + $0xf0] sm:$0xff]  ;;  %vm654_vm1 = vcmask 1041408  }
  0xce   : > { %v564_v15 = vld [vmem:[%s1309_s1 + $0x1f8] sm:$0xff]  ;;  %611 = vmatpush.msra.mxu2 %v532_v14  ;;  %v562_v17 = vld [vmem:[%s1309_s1 + $0x1e8] sm:$0xff]  ;;  %v563_v22 = vld [vmem:[%s1309_s1 + $0x1f0] sm:$0xff]  ;;  %571 = vmatpush.msra.mxu0 %v531_v20 }
  0xcf   : > { %631 = vmatpush.msra.mxu3 %v564_v15  ;;  %v528_v18 = vld [vmem:[%s1309_s1 + $0xd8] sm:$0xff]  ;;  %v526_v21 = vld [vmem:[%s1309_s1 + $0xc8] sm:$0xff]  ;;  %591 = vmatpush.msra.mxu1 %v563_v22  ;;  %v529_v24 = vld [vmem:[%s1309_s1 + $0xe0] sm:$0xff] }
  0xd0   : > { %v560_v19 = vld [vmem:[%s1309_s1 + $0x1d8] sm:$0xff]  ;;  %612 = vmatpush.msra.mxu2 %v530_v16  ;;  %v558_v23 = vld [vmem:[%s1309_s1 + $0x1c8] sm:$0xff]  ;;  %v561_v25 = vld [vmem:[%s1309_s1 + $0x1e0] sm:$0xff]  ;;  %572 = vmatpush.msra.mxu0 %v529_v24 }
  0xd1   : > { %632 = vmatpush.msra.mxu3 %v562_v17  ;;  %v527_v26 = vld [vmem:[%s1309_s1 + $0xd0] sm:$0xff]  ;;  %v524_v28 = vld [vmem:[%s1309_s1 + $0xb8] sm:$0xff]  ;;  %592 = vmatpush.msra.mxu1 %v561_v25  ;;  %v525_v30 = vld [vmem:[%s1309_s1 + $0xc0] sm:$0xff] }
  0xd2   : > { %613 = vmatpush.msra.mxu2 %v528_v18  ;;  %v559_v27 = vld [vmem:[%s1309_s1 + $0x1d0] sm:$0xff]  ;;  %v556_v29 = vld [vmem:[%s1309_s1 + $0x1b8] sm:$0xff]  ;;  %v557_v31 = vld [vmem:[%s1309_s1 + $0x1c0] sm:$0xff]  ;;  %573 = vmatpush.msra.mxu0 %v527_v26 }
  0xd3   : > { %633 = vmatpush.msra.mxu3 %v560_v19  ;;  %v522_v32 = vld [vmem:[%s1309_s1 + $0xa8] sm:$0xff]  ;;  %593 = vmatpush.msra.mxu1 %v559_v27  ;;  %v523_v34 = vld [vmem:[%s1309_s1 + $0xb0] sm:$0xff]  ;;  %v520_v36 = vld [vmem:[%s1309_s1 + $0x98] sm:$0xff] }
  0xd4   : > { %614 = vmatpush.msra.mxu2 %v526_v21  ;;  %v554_v33 = vld [vmem:[%s1309_s1 + $0x1a8] sm:$0xff]  ;;  %v555_v35 = vld [vmem:[%s1309_s1 + $0x1b0] sm:$0xff]  ;;  %v552_v37 = vld [vmem:[%s1309_s1 + $0x198] sm:$0xff]  ;;  %574 = vmatpush.msra.mxu0 %v525_v30 }
  0xd5   : > { %634 = vmatpush.msra.mxu3 %v558_v23  ;;  %594 = vmatpush.msra.mxu1 %v557_v31  ;;  %v521_v38 = vld [vmem:[%s1309_s1 + $0xa0] sm:$0xff]  ;;  %v518_v40 = vld [vmem:[%s1309_s1 + $0x88] sm:$0xff]  ;;  %v519_v42 = vld [vmem:[%s1309_s1 + $0x90] sm:$0xff] }
  0xd6   : > { %615 = vmatpush.msra.mxu2 %v524_v28  ;;  %v553_v39 = vld [vmem:[%s1309_s1 + $0x1a0] sm:$0xff]  ;;  %v550_v41 = vld [vmem:[%s1309_s1 + $0x188] sm:$0xff]  ;;  %575 = vmatpush.msra.mxu0 %v523_v34  ;;  %v551_v43 = vld [vmem:[%s1309_s1 + $0x190] sm:$0xff] }
  0xd7   : > { %635 = vmatpush.msra.mxu3 %v556_v29  ;;  %595 = vmatpush.msra.mxu1 %v555_v35  ;;  %v516_v44 = vld [vmem:[%s1309_s1 + $0x78] sm:$0xff]  ;;  %v517_v46 = vld [vmem:[%s1309_s1 + $0x80] sm:$0xff]  ;;  %v514_v48 = vld [vmem:[%s1309_s1 + $0x68] sm:$0xff] }
  0xd8   : > { %616 = vmatpush.msra.mxu2 %v522_v32  ;;  %v548_v45 = vld [vmem:[%s1309_s1 + $0x178] sm:$0xff]  ;;  %576 = vmatpush.msra.mxu0 %v521_v38  ;;  %v549_v47 = vld [vmem:[%s1309_s1 + $0x180] sm:$0xff]  ;;  %v546_v49 = vld [vmem:[%s1309_s1 + $0x168] sm:$0xff] }
  0xd9   : > { %636 = vmatpush.msra.mxu3 %v554_v33  ;;  %596 = vmatpush.msra.mxu1 %v553_v39  ;;  %v515_v50 = vld [vmem:[%s1309_s1 + $0x70] sm:$0xff]  ;;  %v512_v52 = vld [vmem:[%s1309_s1 + $0x58] sm:$0xff]  ;;  %v500_v54 = vld [vmem:[%s903_s6] sm:$0xf] }
  0xda   : > { %617 = vmatpush.msra.mxu2 %v520_v36  ;;  %577 = vmatpush.msra.mxu0 %v519_v42  ;;  %v547_v51 = vld [vmem:[%s1309_s1 + $0x170] sm:$0xff]  ;;  %v544_v53 = vld [vmem:[%s1309_s1 + $0x158] sm:$0xff]  ;;  %v513_v55 = vld [vmem:[%s1309_s1 + $0x60] sm:$0xff]  ;;  %566 = vst [vmem:[#allocation1] ss:$4 sm:$0xff] %v500_v54 }
  0xdb   : > { %637 = vmatpush.msra.mxu3 %v552_v37  ;;  %597 = vmatpush.msra.mxu1 %v551_v43  ;;  %v545_v56 = vld [vmem:[%s1309_s1 + $0x160] sm:$0xff]  ;;  %v510_v57 = vld [vmem:[%s1309_s1 + $0x48] sm:$0xff]  ;;  %v511_v59 = vld [vmem:[%s1309_s1 + $0x50] sm:$0xff] }
  0xdc   : > { %618 = vmatpush.msra.mxu2 %v518_v40  ;;  %578 = vmatpush.msra.mxu0 %v517_v46  ;;  %v542_v58 = vld [vmem:[%s1309_s1 + $0x148] sm:$0xff]  ;;  %v543_v60 = vld [vmem:[%s1309_s1 + $0x150] sm:$0xff]  ;;  %v508_v61 = vld [vmem:[%s1309_s1 + $0x38] sm:$0xff] }
  0xdd   : > { %638 = vmatpush.msra.mxu3 %v550_v41  ;;  %598 = vmatpush.msra.mxu1 %v549_v47  ;;  %v540_v62 = vld [vmem:[%s1309_s1 + $0x138] sm:$0xff]  ;;  %v509_v63 = vld [vmem:[%s1309_s1 + $0x40] sm:$0xff]  ;;  %v506_v1 = vld [vmem:[%s1309_s1 + $0x28] sm:$0xff] }
  0xde   : > { %619 = vmatpush.msra.mxu2 %v516_v44  ;;  %579 = vmatpush.msra.mxu0 %v515_v50  ;;  %v541_v0 = vld [vmem:[%s1309_s1 + $0x140] sm:$0xff]  ;;  %v538_v2 = vld [vmem:[%s1309_s1 + $0x128] sm:$0xff]  ;;  %v507_v3 = vld [vmem:[%s1309_s1 + $0x30] sm:$0xff] }
  0xdf   : > { %639 = vmatpush.msra.mxu3 %v548_v45  ;;  %599 = vmatpush.msra.mxu1 %v547_v51  ;;  %v539_v4 = vld [vmem:[%s1309_s1 + $0x130] sm:$0xff]  ;;  %v504_v5 = vld [vmem:[%s1309_s1 + $0x18] sm:$0xff]  ;;  %v505_v7 = vld [vmem:[%s1309_s1 + $0x20] sm:$0xff] }
  0xe0   : > { %620 = vmatpush.msra.mxu2 %v514_v48  ;;  %580 = vmatpush.msra.mxu0 %v513_v55  ;;  %v536_v6 = vld [vmem:[%s1309_s1 + $0x118] sm:$0xff]  ;;  %v537_v8 = vld [vmem:[%s1309_s1 + $0x120] sm:$0xff]  ;;  %v502_v9 = vld [vmem:[%s1309_s1 + $0x8] sm:$0xff] }
  0xe1   : > { %640 = vmatpush.msra.mxu3 %v546_v49  ;;  %600 = vmatpush.msra.mxu1 %v545_v56  ;;  %v534_v10 = vld [vmem:[%s1309_s1 + $0x108] sm:$0xff]  ;;  %v567_v11 = vld.sshfl [vmem:[#allocation1] sm:$0xff pattern:$0x73625140]  ;;  %v503_v13 = vld [vmem:[%s1309_s1 + $0x10] sm:$0xff] }
  0xe2   : > { %621 = vmatpush.msra.mxu2 %v512_v52  ;;  %581 = vmatpush.msra.mxu0 %v511_v59  ;;  %v568_v12 = vld.sshfl [vmem:[#allocation1 + $0x8] sm:$0xff pattern:$0x73625140]  ;;  %v535_v14 = vld [vmem:[%s1309_s1 + $0x110] sm:$0xff]  ;;  %v501_v15 = vld [vmem:[%s1309_s1] sm:$0xff] }
  0xe3   : > { %641 = vmatpush.msra.mxu3 %v544_v53  ;;  %601 = vmatpush.msra.mxu1 %v543_v60  ;;  %v533_v16 = vld [vmem:[%s1309_s1 + $0x100] sm:$0xff]  ;;  %v499_v24 = vld [vmem:[#allocation2] sm:$0xf] }
  0xe4   : > { %622 = vmatpush.msra.mxu2 %v510_v57  ;;  %582 = vmatpush.msra.mxu0 %v509_v63 }
  0xe5   : > { %642 = vmatpush.msra.mxu3 %v542_v58  ;;  %602 = vmatpush.msra.mxu1 %v541_v0 }
  0xe6   : > { %623 = vmatpush.msra.mxu2 %v508_v61  ;;  %583 = vmatpush.msra.mxu0 %v507_v3 }
  0xe7   : > { %643 = vmatpush.msra.mxu3 %v540_v62  ;;  %603 = vmatpush.msra.mxu1 %v539_v4 }
  0xe8   : > { %624 = vmatpush.msra.mxu2 %v506_v1  ;;  %584 = vmatpush.msra.mxu0 %v505_v7 }
  0xe9   : > { %644 = vmatpush.msra.mxu3 %v538_v2  ;;  %604 = vmatpush.msra.mxu1 %v537_v8 }
  0xea   : > { %625 = vmatpush.msra.mxu2 %v504_v5  ;;  %585 = vmatpush.msra.mxu0 %v503_v13 }
  0xeb   : > { %645 = vmatpush.msra.mxu3 %v536_v6  ;;  %605 = vmatpush.msra.mxu1 %v535_v14 }
  0xec   : > { %626 = vmatpush.msra.mxu2 %v502_v9  ;;  %586 = vmatpush.msra.mxu0 %v501_v15 }
  0xed   : > { %646 = vmatpush.msra.mxu3 %v534_v10  ;;  %627 = vmatmul.f32.vlgmr.msra.gmra.mxu2 %v567_v11 }
  0xee   : > { %647 = vmatmul.f32.vlgmr.msra.gmra.mxu3 %v568_v12  ;;  %606 = vmatpush.msra.mxu1 %v533_v16 }
  0xef   : > { %587 = vmatmul.f32.vlgmr.msra.gmra.mxu0 %v567_v11  ;;  %607 = vmatmul.f32.vlgmr.msra.gmra.mxu1 %v568_v12 }
 0x16c   : > { %v588_v17 = vpop.f32.mrf.mxu0  ;;  %v608_v18 = vpop.f32.mrf.mxu1 }
 0x16d   : > { %v609_v22 = vadd.f32 %v608_v18, %v588_v17 }
 0x170   : > { %v628_v19 = vpop.f32.mrf.mxu2 }
 0x171   : > { %v648_v20 = vpop.f32.mrf.mxu3 }
 0x172   : > { %v649_v21 = vadd.f32 %v648_v20, %v628_v19 }
 0x174   : > { %v653_v23 = vrot.slane %v649_v21, 6 }
 0x176   : > { %v655_v25 = vsel %vm654_vm1, %v609_v22, %v653_v23 }
 0x177   : > { %v657_v26 = vadd.f32 %v655_v25, %v499_v24 }
 0x179   : > { %658 = vst [vmem:[#allocation2] sm:$0xf] %v657_v26 }
 0x17a PF:  {}
 0x180   : > { %v662_v27 = vld [vmem:[#allocation2] sm:$0xf] }
 0x181   : > { %663 = vst [vmem:[%s908_s10] sm:$0xf] %v662_v27 }
 0x182 PF: > { %s14_s17 = sadd.s32 1, %s839_s17   ;;  %s1313_s15 = smov %s835_s16 }
 0x183   : > { %p11_p11 = scmp.ge.s32.totalorder %s14_s17, 6   ;;  %s1314_s16 = smov %s1316_s18 }
 0x185   :  { %13 = sbr.rel (!%p11_p11) target bundleno = 2 (0x2), region = 91 }

</bundles_post_ra>
